<compile_context>
chip_gen: v7x
topology: tpu7x:2x2x1
jax: 0.10.0
libtpu: 0.0.40
codegen_flags: <defaults>
</compile_context>

<pallas_src>
import functools

import jax
import jax.numpy as jnp
from jax import lax
from jax.experimental import pallas as pl
from jax.experimental.pallas import tpu as pltpu

EMBED_MAX_NORM = 1.0  # config['EMBED_MAX_NORM']
_EPS = 1e-7           # PyTorch renorm eps


# ---------------------------------------------------------------------------
# Kernel 1: gather + max_norm renorm + mean over the context axis
# ---------------------------------------------------------------------------
def _pool_kernel(idx_ref, *refs):
    """refs = (emb_row_ref_0, ..., emb_row_ref_{C-1}, out_ref).

    Each emb_row_ref_k is a (1, 1, D) block of the embedding table, gathered by
    the data-dependent index_map (row = idx_ref[b, k]).  out_ref is (1, 1, D).
    """
    del idx_ref  # only used inside the BlockSpec index_maps
    emb_refs = refs[:-1]
    out_ref = refs[-1]
    inv_c = jnp.float32(1.0 / len(emb_refs))

    acc = jnp.zeros(out_ref.shape[1:], jnp.float32)  # (1, D)
    for r in emb_refs:  # static loop over the (small) context size
        e = r[0].astype(jnp.float32)  # (1, D)
        # nn.Embedding(max_norm=...): rows with ||e|| > max_norm are rescaled.
        # Squared-norm test + rsqrt keeps the whole renorm on the EUP slot.
        n2 = jnp.sum(e * e, axis=-1, keepdims=True)  # (1, 1)
        scale = jnp.where(
            n2 > EMBED_MAX_NORM * EMBED_MAX_NORM,
            EMBED_MAX_NORM * lax.rsqrt(n2 + _EPS * _EPS),
            1.0,
        )
        acc = acc + e * scale
    out_ref[0] = acc * inv_c  # mean over context


def _cbow_pool(inputs_, emb_weight):
    """inputs_: (B, C) int32, emb_weight: (V, D) -> pooled (B, D) float32."""
    B, C = inputs_.shape
    V, D = emb_weight.shape
    emb3 = emb_weight.reshape(V, 1, D)  # free reshape -> (1,1,D) row blocks

    def emb_index_map(b, idx_ref, *, k):
        return (idx_ref[b, k], 0, 0)  # data-dependent row gather

    in_specs = [
        pl.BlockSpec((1, 1, D), functools.partial(emb_index_map, k=k))
        for k in range(C)
    ]

    pooled = pl.pallas_call(
        _pool_kernel,
        out_shape=jax.ShapeDtypeStruct((B, 1, D), jnp.float32),
        grid_spec=pltpu.PrefetchScalarGridSpec(
            num_scalar_prefetch=1,       # inputs_ lives in SMEM, feeds index_maps
            grid=(B,),
            in_specs=in_specs,
            out_specs=pl.BlockSpec((1, 1, D), lambda b, idx_ref: (b, 0, 0)),
        ),
        compiler_params=pltpu.CompilerParams(
            dimension_semantics=("parallel",),  # batch rows are independent
        ),
    )(inputs_.astype(jnp.int32), *([emb3] * C))
    return pooled.reshape(B, D)


# ---------------------------------------------------------------------------
# Kernel 2: tiled Linear  (B, D) @ (V, D)^T + bias
# ---------------------------------------------------------------------------
def _linear_kernel(m_ref, w_ref, b_ref, out_ref):
    # (TILE_B, D) x (TILE_V, D) contracted on D  ->  lane-dense (TILE_B, TILE_V)
    out_ref[...] = (
        lax.dot_general(
            m_ref[...],
            w_ref[...],
            dimension_numbers=(((1,), (1,)), ((), ())),
            preferred_element_type=jnp.float32,
        )
        + b_ref[...]
    )


def _pick_tile(n, candidates):
    for c in candidates:
        if c <= n and n % c == 0:
            return c
    return n


def _cbow_linear(pooled, lin_weight, lin_bias):
    """pooled: (B, D), lin_weight: (V, D) (PyTorch layout), lin_bias: (V,)."""
    B, D = pooled.shape
    V = lin_weight.shape[0]

    # Lane-dense V tiles (multiple of 128), VMEM-safe on v5e/v6e/v7x.
    tile_v = _pick_tile(V, (2048, 1024, 512, 256, 128))
    tile_b = _pick_tile(B, (256, 128, 64, 32, 16, 8))
    bias2 = lin_bias.reshape(1, V)

    grid = (V // tile_v, B // tile_b)  # V outer -> weight tile resident over B loop
    return pl.pallas_call(
        _linear_kernel,
        out_shape=jax.ShapeDtypeStruct((B, V), jnp.float32),
        grid_spec=pltpu.PrefetchScalarGridSpec(
            num_scalar_prefetch=0,
            grid=grid,
            in_specs=[
                pl.BlockSpec((tile_b, D), lambda j, i: (i, 0)),   # pooled
                pl.BlockSpec((tile_v, D), lambda j, i: (j, 0)),   # weight (native layout)
                pl.BlockSpec((1, tile_v), lambda j, i: (0, j)),   # bias
            ],
            out_specs=pl.BlockSpec((tile_b, tile_v), lambda j, i: (i, j)),
        ),
        compiler_params=pltpu.CompilerParams(
            dimension_semantics=("parallel", "parallel"),  # no reduction axis (D in one block)
        ),
    )(pooled, lin_weight, bias2)


# ---------------------------------------------------------------------------
# Forward pass
# ---------------------------------------------------------------------------
def cbow_forward(inputs_, emb_weight, lin_weight, lin_bias):
    """Pallas-backed forward of CBOW_MODEL.

    inputs_   : (B, C) int32
    emb_weight: (V, D) float32
    lin_weight: (V, D) float32 (PyTorch nn.Linear layout, NOT transposed)
    lin_bias  : (V,)   float32
    returns   : (B, V) float32 logits
    """
    # TODO(synk): nn.Embedding(max_norm=...) also renormalizes the embedding
    # table in place as a lookup side effect; only the forward activations are
    # replicated here (training-time weight mutation is not).
    pooled = _cbow_pool(inputs_, emb_weight)
    return _cbow_linear(pooled, lin_weight, lin_bias)


def cbow_reference(inputs_, emb_weight, lin_weight, lin_bias):
    e = jnp.take(emb_weight, inputs_, axis=0)
    norm = jnp.sqrt(jnp.sum(e * e, axis=-1, keepdims=True))
    scale = jnp.where(norm > EMBED_MAX_NORM, EMBED_MAX_NORM / (norm + _EPS), 1.0)
    e = e * scale
    m = jnp.mean(e, axis=1)
    return (
        jnp.matmul(m, lin_weight.T, precision=jax.lax.Precision.HIGHEST) + lin_bias
    )


if __name__ == "__main__":
    VOCAB_SIZE = 256   # vocab_size
    EMBED_DIM = 128    # config['EMBED_DIMENSION']
    BATCH = 8
    CONTEXT = 4        # CBOW context window (axis=1 of inputs_)

    key = jax.random.PRNGKey(0)
    k_emb, k_w, k_b, k_idx = jax.random.split(key, 4)

    emb_weight = jax.random.normal(k_emb, (VOCAB_SIZE, EMBED_DIM), jnp.float32)
    bound = 1.0 / jnp.sqrt(EMBED_DIM)
    lin_weight = jax.random.uniform(
        k_w, (VOCAB_SIZE, EMBED_DIM), jnp.float32, -bound, bound
    )
    lin_bias = jax.random.uniform(k_b, (VOCAB_SIZE,), jnp.float32, -bound, bound)
    inputs_ = jax.random.randint(k_idx, (BATCH, CONTEXT), 0, VOCAB_SIZE, jnp.int32)

    out = cbow_forward(inputs_, emb_weight, lin_weight, lin_bias)
    out = jax.block_until_ready(out)

    ref = cbow_reference(inputs_, emb_weight, lin_weight, lin_bias)
    assert out.shape == (BATCH, VOCAB_SIZE)
    assert jnp.allclose(out, ref, atol=1e-4, rtol=1e-4), float(
        jnp.max(jnp.abs(out - ref))
    )

    print("KERNEL_OK")
</pallas_src>

<mosaic_0001>
module attributes {stable_mosaic.version = 11 : i64} {
  func.func @_pool_kernel(%arg0: i32, %arg1: memref<8x4xi32, #tpu.memory_space<smem>>, %arg2: memref<1x1x128xf32, #tpu.memory_space<vmem>>, %arg3: memref<1x1x128xf32, #tpu.memory_space<vmem>>, %arg4: memref<1x1x128xf32, #tpu.memory_space<vmem>>, %arg5: memref<1x1x128xf32, #tpu.memory_space<vmem>>, %arg6: memref<1x1x128xf32, #tpu.memory_space<vmem>>) attributes {dimension_semantics = [#tpu.dimension_semantics<parallel>], iteration_bounds = array<i64: 8>, scalar_prefetch = 1 : i64, scratch_operands = 0 : i64, tpu.core_type = #tpu.core_type<tc>, window_params = [{transform_indices = @transform_0, window_bounds = array<i64: 1, 1, 128>}, {transform_indices = @transform_1, window_bounds = array<i64: 1, 1, 128>}, {transform_indices = @transform_2, window_bounds = array<i64: 1, 1, 128>}, {transform_indices = @transform_3, window_bounds = array<i64: 1, 1, 128>}, {transform_indices = @transform_4, window_bounds = array<i64: 1, 1, 128>}]} {
    %cst = arith.constant 0.000000e+00 : f32
    %0 = vector.broadcast %cst : f32 to vector<1x128xf32>
    %c0 = arith.constant 0 : index
    %c0_0 = arith.constant 0 : index
    %c0_1 = arith.constant 0 : index
    %1 = vector.load %arg2[%c0, %c0_0, %c0_1] : memref<1x1x128xf32, #tpu.memory_space<vmem>>, vector<1x1x128xf32>
    %2 = vector.shape_cast %1 : vector<1x1x128xf32> to vector<1x128xf32>
    %3 = arith.mulf %2, %2 : vector<1x128xf32>
    %cst_2 = arith.constant dense<0.000000e+00> : vector<1xf32>
    %4 = vector.multi_reduction <add>, %3, %cst_2 [1] : vector<1x128xf32> to vector<1xf32>
    %5 = vector.shape_cast %4 : vector<1xf32> to vector<1x1xf32>
    %cst_3 = arith.constant 1.000000e+00 : f32
    %6 = vector.broadcast %cst_3 : f32 to vector<1x1xf32>
    %7 = arith.cmpf ogt, %5, %6 : vector<1x1xf32>
    %cst_4 = arith.constant 9.99999982E-15 : f32
    %8 = vector.broadcast %cst_4 : f32 to vector<1x1xf32>
    %9 = arith.addf %5, %8 : vector<1x1xf32>
    %10 = math.rsqrt %9 : vector<1x1xf32>
    %cst_5 = arith.constant 1.000000e+00 : f32
    %11 = vector.broadcast %cst_5 : f32 to vector<1x1xf32>
    %12 = arith.mulf %11, %10 : vector<1x1xf32>
    %cst_6 = arith.constant 1.000000e+00 : f32
    %13 = vector.broadcast %cst_6 : f32 to vector<1x1xf32>
    %14 = arith.select %7, %12, %13 : vector<1x1xi1>, vector<1x1xf32>
    %15 = vector.broadcast %14 : vector<1x1xf32> to vector<1x128xf32>
    %16 = arith.mulf %2, %15 : vector<1x128xf32>
    %17 = arith.addf %0, %16 : vector<1x128xf32>
    %c0_7 = arith.constant 0 : index
    %c0_8 = arith.constant 0 : index
    %c0_9 = arith.constant 0 : index
    %18 = vector.load %arg3[%c0_7, %c0_8, %c0_9] : memref<1x1x128xf32, #tpu.memory_space<vmem>>, vector<1x1x128xf32>
    %19 = vector.shape_cast %18 : vector<1x1x128xf32> to vector<1x128xf32>
    %20 = arith.mulf %19, %19 : vector<1x128xf32>
    %cst_10 = arith.constant dense<0.000000e+00> : vector<1xf32>
    %21 = vector.multi_reduction <add>, %20, %cst_10 [1] : vector<1x128xf32> to vector<1xf32>
    %22 = vector.shape_cast %21 : vector<1xf32> to vector<1x1xf32>
    %cst_11 = arith.constant 1.000000e+00 : f32
    %23 = vector.broadcast %cst_11 : f32 to vector<1x1xf32>
    %24 = arith.cmpf ogt, %22, %23 : vector<1x1xf32>
    %cst_12 = arith.constant 9.99999982E-15 : f32
    %25 = vector.broadcast %cst_12 : f32 to vector<1x1xf32>
    %26 = arith.addf %22, %25 : vector<1x1xf32>
    %27 = math.rsqrt %26 : vector<1x1xf32>
    %cst_13 = arith.constant 1.000000e+00 : f32
    %28 = vector.broadcast %cst_13 : f32 to vector<1x1xf32>
    %29 = arith.mulf %28, %27 : vector<1x1xf32>
    %cst_14 = arith.constant 1.000000e+00 : f32
    %30 = vector.broadcast %cst_14 : f32 to vector<1x1xf32>
    %31 = arith.select %24, %29, %30 : vector<1x1xi1>, vector<1x1xf32>
    %32 = vector.broadcast %31 : vector<1x1xf32> to vector<1x128xf32>
    %33 = arith.mulf %19, %32 : vector<1x128xf32>
    %34 = arith.addf %17, %33 : vector<1x128xf32>
    %c0_15 = arith.constant 0 : index
    %c0_16 = arith.constant 0 : index
    %c0_17 = arith.constant 0 : index
    %35 = vector.load %arg4[%c0_15, %c0_16, %c0_17] : memref<1x1x128xf32, #tpu.memory_space<vmem>>, vector<1x1x128xf32>
    %36 = vector.shape_cast %35 : vector<1x1x128xf32> to vector<1x128xf32>
    %37 = arith.mulf %36, %36 : vector<1x128xf32>
    %cst_18 = arith.constant dense<0.000000e+00> : vector<1xf32>
    %38 = vector.multi_reduction <add>, %37, %cst_18 [1] : vector<1x128xf32> to vector<1xf32>
    %39 = vector.shape_cast %38 : vector<1xf32> to vector<1x1xf32>
    %cst_19 = arith.constant 1.000000e+00 : f32
    %40 = vector.broadcast %cst_19 : f32 to vector<1x1xf32>
    %41 = arith.cmpf ogt, %39, %40 : vector<1x1xf32>
    %cst_20 = arith.constant 9.99999982E-15 : f32
    %42 = vector.broadcast %cst_20 : f32 to vector<1x1xf32>
    %43 = arith.addf %39, %42 : vector<1x1xf32>
    %44 = math.rsqrt %43 : vector<1x1xf32>
    %cst_21 = arith.constant 1.000000e+00 : f32
    %45 = vector.broadcast %cst_21 : f32 to vector<1x1xf32>
    %46 = arith.mulf %45, %44 : vector<1x1xf32>
    %cst_22 = arith.constant 1.000000e+00 : f32
    %47 = vector.broadcast %cst_22 : f32 to vector<1x1xf32>
    %48 = arith.select %41, %46, %47 : vector<1x1xi1>, vector<1x1xf32>
    %49 = vector.broadcast %48 : vector<1x1xf32> to vector<1x128xf32>
    %50 = arith.mulf %36, %49 : vector<1x128xf32>
    %51 = arith.addf %34, %50 : vector<1x128xf32>
    %c0_23 = arith.constant 0 : index
    %c0_24 = arith.constant 0 : index
    %c0_25 = arith.constant 0 : index
    %52 = vector.load %arg5[%c0_23, %c0_24, %c0_25] : memref<1x1x128xf32, #tpu.memory_space<vmem>>, vector<1x1x128xf32>
    %53 = vector.shape_cast %52 : vector<1x1x128xf32> to vector<1x128xf32>
    %54 = arith.mulf %53, %53 : vector<1x128xf32>
    %cst_26 = arith.constant dense<0.000000e+00> : vector<1xf32>
    %55 = vector.multi_reduction <add>, %54, %cst_26 [1] : vector<1x128xf32> to vector<1xf32>
    %56 = vector.shape_cast %55 : vector<1xf32> to vector<1x1xf32>
    %cst_27 = arith.constant 1.000000e+00 : f32
    %57 = vector.broadcast %cst_27 : f32 to vector<1x1xf32>
    %58 = arith.cmpf ogt, %56, %57 : vector<1x1xf32>
    %cst_28 = arith.constant 9.99999982E-15 : f32
    %59 = vector.broadcast %cst_28 : f32 to vector<1x1xf32>
    %60 = arith.addf %56, %59 : vector<1x1xf32>
    %61 = math.rsqrt %60 : vector<1x1xf32>
    %cst_29 = arith.constant 1.000000e+00 : f32
    %62 = vector.broadcast %cst_29 : f32 to vector<1x1xf32>
    %63 = arith.mulf %62, %61 : vector<1x1xf32>
    %cst_30 = arith.constant 1.000000e+00 : f32
    %64 = vector.broadcast %cst_30 : f32 to vector<1x1xf32>
    %65 = arith.select %58, %63, %64 : vector<1x1xi1>, vector<1x1xf32>
    %66 = vector.broadcast %65 : vector<1x1xf32> to vector<1x128xf32>
    %67 = arith.mulf %53, %66 : vector<1x128xf32>
    %68 = arith.addf %51, %67 : vector<1x128xf32>
    %cst_31 = arith.constant 2.500000e-01 : f32
    %69 = vector.broadcast %cst_31 : f32 to vector<1x128xf32>
    %70 = arith.mulf %68, %69 : vector<1x128xf32>
    %c0_32 = arith.constant 0 : index
    %c0_33 = arith.constant 0 : index
    %c0_34 = arith.constant 0 : index
    %71 = vector.load %arg6[%c0_32, %c0_33, %c0_34] : memref<1x1x128xf32, #tpu.memory_space<vmem>>, vector<1x1x128xf32>
    %72 = vector.shape_cast %71 : vector<1x1x128xf32> to vector<1x128xf32>
    %73 = vector.shape_cast %70 : vector<1x128xf32> to vector<1x1x128xf32>
    tpu.vector_store %arg6[%c0_32, %c0_33, %c0_34], %73 {strides = array<i32>} : memref<1x1x128xf32, #tpu.memory_space<vmem>>, vector<1x1x128xf32>,
    return
  }
  func.func @transform_0(%arg0: i32, %arg1: memref<8x4xi32, #tpu.memory_space<smem>>) -> (i32, i32, i32) {
    %0 = arith.index_cast %arg0 : i32 to index
    %c0 = arith.constant 0 : index
    %1 = memref.load %arg1[%0, %c0] : memref<8x4xi32, #tpu.memory_space<smem>>
    %c0_i32 = arith.constant 0 : i32
    %c0_i32_0 = arith.constant 0 : i32
    %c0_i32_1 = arith.constant 0 : i32
    return %1, %c0_i32, %c0_i32_0 : i32, i32, i32
  }
  func.func @transform_1(%arg0: i32, %arg1: memref<8x4xi32, #tpu.memory_space<smem>>) -> (i32, i32, i32) {
    %0 = arith.index_cast %arg0 : i32 to index
    %c1 = arith.constant 1 : index
    %1 = memref.load %arg1[%0, %c1] : memref<8x4xi32, #tpu.memory_space<smem>>
    %c0_i32 = arith.constant 0 : i32
    %c0_i32_0 = arith.constant 0 : i32
    %c0_i32_1 = arith.constant 0 : i32
    return %1, %c0_i32, %c0_i32_0 : i32, i32, i32
  }
  func.func @transform_2(%arg0: i32, %arg1: memref<8x4xi32, #tpu.memory_space<smem>>) -> (i32, i32, i32) {
    %0 = arith.index_cast %arg0 : i32 to index
    %c2 = arith.constant 2 : index
    %1 = memref.load %arg1[%0, %c2] : memref<8x4xi32, #tpu.memory_space<smem>>
    %c0_i32 = arith.constant 0 : i32
    %c0_i32_0 = arith.constant 0 : i32
    %c0_i32_1 = arith.constant 0 : i32
    return %1, %c0_i32, %c0_i32_0 : i32, i32, i32
  }
  func.func @transform_3(%arg0: i32, %arg1: memref<8x4xi32, #tpu.memory_space<smem>>) -> (i32, i32, i32) {
    %0 = arith.index_cast %arg0 : i32 to index
    %c3 = arith.constant 3 : index
    %1 = memref.load %arg1[%0, %c3] : memref<8x4xi32, #tpu.memory_space<smem>>
    %c0_i32 = arith.constant 0 : i32
    %c0_i32_0 = arith.constant 0 : i32
    %c0_i32_1 = arith.constant 0 : i32
    return %1, %c0_i32, %c0_i32_0 : i32, i32, i32
  }
  func.func @transform_4(%arg0: i32, %arg1: memref<8x4xi32, #tpu.memory_space<smem>>) -> (i32, i32, i32) {
    %c0_i32 = arith.constant 0 : i32
    %c0_i32_0 = arith.constant 0 : i32
    %c0_i32_1 = arith.constant 0 : i32
    return %arg0, %c0_i32, %c0_i32_0 : i32, i32, i32
  }
}

</mosaic_0001>

<bundles_post_ra>
// kernel: tpu_custom_call.1
= control target key start
LH: loop header
LB: loop body
LE: loop exit
PB: predicated region body
PF: predicated region fallthrough
CT: control target
= control target key end

     0   :  { %s1629_s0 = inlined_call_operand.vmem [shape: s32[8,4], index: 0, kind: input, shape index: {}]   ;;  %s1630_s1 = inlined_call_operand.hbm [shape: f32[256,1,128], index: 1, kind: input, shape index: {}]   ;;  %s1631_s2 = inlined_call_operand.hbm [shape: f32[256,1,128], index: 2, kind: input, shape index: {}]   ;;  %s1632_s3 = inlined_call_operand.hbm [shape: f32[256,1,128], index: 3, kind: input, shape index: {}]   ;;  %s1633_s4 = inlined_call_operand.hbm [shape: f32[256,1,128], index: 4, kind: input, shape index: {}]   ;;  %s1634_s5 = inlined_call_operand.hbm [shape: f32[8,1,128], index: 5, kind: output, shape index: {}]  }
   0x1   :  { %1656 = sst [smem:[#allocation39_spill]] %s1630_s1  ;;  %s10_s20 = sshll.u32 %s1629_s0, 4  ;;  %s11_s20 = int_to_ptr.vmem [resolvable:$true] %s10_s20 }
   0x2   :  { %1657 = sst [smem:[#allocation40_spill]] %s1631_s2  ;;  %s752_s21 = scalar_lea.vmem %s11_s20, 128 }
   0x3   :  { %1658 = sst [smem:[#allocation41_spill]] %s1633_s4  ;;  %p753_p0 = scmp.ne.s32.totalorder %s11_s20, %s752_s21 }
   0x4   :  { %1659 = sst [smem:[#allocation42_spill]] %s1634_s5  ;;  %p757_p1 = scmp.lt.s32.totalorder %s11_s20, %s11_s20 }
   0x5   :  { %p758_p2 = scmp.lt.s32.totalorder %s752_s21, %s752_s21 }
   0x7   :  { %p759_p3 = por %p758_p2, %p757_p1 }
   0x9   :  { %p760_p4 = pnand %p759_p3, %p753_p0 }
   0xb   :  { %763 = shalt.err (!%p760_p4)  }
   0xc   :  { %s1062_s22 = smov [#allocation3]  }
   0xd   :  { %13 = dma.vmem_to_smem %s11_s20, 128, %s1062_s22, [#allocation2] }
   0xe   :  { %976 = dma.done.wait [#allocation2], 128 }
   0xf   :  { %977 = vsyncadd [#allocation2], 4294967168 }
  0x10   :  { %15 = sfence }
  0x11   :  { %16 = vsyncpa [#allocation5], 0 }
  0x12   :  { %18 = vsyncpa [#allocation5 + $0x1], 0 }
  0x13   :  { %19 = vsyncpa [#allocation8], 0 }
  0x14   :  { %21 = vsyncpa [#allocation8 + $0x1], 0 }
  0x15   :  { %22 = vsyncpa [#allocation11], 0 }
  0x16   :  { %24 = vsyncpa [#allocation11 + $0x1], 0 }
  0x17   :  { %25 = vsyncpa [#allocation6], 0 }
  0x18   :  { %27 = vsyncpa [#allocation6 + $0x1], 0  ;;  %s1101_s0 = smov 0   ;;  %s1103_s23 = smov 0  }
  0x19   :  { %s1105_s24 = smov 0   ;;  %s1107_s25 = smov 0  }
  0x1a   :  { %s1109_s26 = smov 0   ;;  %s1111_s27 = smov 0  }
  0x1b   :  { %s1113_s28 = smov 0   ;;  %s1115_s29 = smov 0  }
  0x1c   :  { %s1117_s30 = smov 0   ;;  %s1119_s6 = smov 0  }
  0x1d   :  { %s1121_s7 = smov 0   ;;  %s1123_s8 = smov 0  }
  0x1e   :  { %s1125_s9 = smov 0   ;;  %s1127_s10 = smov 0  }
  0x1f   :  { %s1129_s11 = smov 0   ;;  %s1131_s12 = smov 0  }
  0x20 LB: > { %1660 = sst [smem:[#allocation27_spill]] %s1000_s0  ;;  %s1180_s13 = sadd.s32 4294967295, %s1060_s12   ;;  %s1060_s12 = sphi %s1131_s12, %s1719_s12   ;;  %s1056_s11 = sphi %s1129_s11, %s1738_s11   ;;  %s1052_s10 = sphi %s1127_s10, %s1737_s10   ;;  %s1048_s9 = sphi %s1125_s9, %s1736_s9   ;;  %s1044_s8 = sphi %s1123_s8, %s1725_s8   ;;  %s1040_s7 = sphi %s1121_s7, %s1724_s7   ;;  %s1036_s6 = sphi %s1119_s6, %s1723_s6   ;;  %s1032_s30 = sphi %s1117_s30, %s1735_s30   ;;  %s1028_s29 = sphi %s1115_s29, %s1734_s29   ;;  %s1024_s28 = sphi %s1113_s28, %s1733_s28   ;;  %s1020_s27 = sphi %s1111_s27, %s1732_s27   ;;  %s1016_s26 = sphi %s1109_s26, %s1731_s26   ;;  %s1012_s25 = sphi %s1107_s25, %s1730_s25   ;;  %s1008_s24 = sphi %s1105_s24, %s1721_s24   ;;  %s1004_s23 = sphi %s1103_s23, %s1729_s23   ;;  %s1000_s0 = sphi %s1101_s0, %s1727_s0  }
  0x21   : > { %1661 = sst [smem:[#allocation28_spill]] %s1008_s24  ;;  %s539_s14 = sadd.s32 4294967294, %s1060_s12  }
  0x22   : > { %1662 = sst [smem:[#allocation29_spill]] %s1012_s25  ;;  %s1184_s15 = sadd.s32 1, %s1060_s12  }
  0x23   : > { %1663 = sst [smem:[#allocation30_spill]] %s1040_s7  ;;  %s1187_s16 = sshll.u32 %s1060_s12, 7 }
  0x24   : > { %1664 = sst [smem:[#allocation31_spill]] %s1044_s8  ;;  %s1190_s17 = sadd.s32 128, %s1187_s16 }
  0x25   : > { %1665 = sst [smem:[#allocation32_spill]] %s1184_s15  ;;  %p1650_p5 = scmp.eq.s32.totalorder %s1060_s12, 0 }
  0x26   : > { %p1649_p6 = scmp.eq.s32.totalorder %s1180_s13, 0  ;;  %s68_s18 = sadd.s32 1, %s1187_s16 }
  0x27   : > { %s69_s19 = sld [smem:[#allocation3 + %s68_s18]]  ;;  %s71_s20 = sadd.s32 1, %s1190_s17 }
  0x28   : > { %s72_s21 = sld [smem:[#allocation3 + %s71_s20]]  ;;  %s76_s22 = sadd.s32 1, %s1044_s8 }
  0x29   : > { %p83_p7 = scmp.ne.s32.totalorder %s1044_s8, %s1040_s7  ;;  %p89_p8 = scmp.ne.s32.totalorder %s1040_s7, %s1036_s6 }
  0x2a   : > { %s163_s5 = ssub.s32 %s1060_s12, %s1184_s15  ;;  %s166_s4 = sadd.s32 1, %s1008_s24 }
  0x2b   : > { %p1205_p9 = por %p83_p7, %p1650_p5  ;;  %p1211_p10 = por %p89_p8, %p1649_p6 }
  0x2c   : > { %p164_p11 = scmp.eq.s32.totalorder %s163_s5, 0  ;;  %p176_p12 = scmp.ne.s32.totalorder %s1008_s24, %s1004_s23 }
  0x2d   : > { %s1667_s20 = scalar_select %p1211_p10, 1, 0 }
  0x2e   : > { %p177_p13 = scmp.eq.s32.totalorder %s1180_s13, 7  ;;  %p182_p0 = scmp.ne.s32.totalorder %s1004_s23, %s1000_s0 }
  0x2f   : > { %1668 = sst [smem:[#allocation33_spill]] %s1667_s20  ;;  %s73_s6 = ssub.s32 %s69_s19, %s72_s21 }
  0x30   : > { %p183_p1 = scmp.eq.s32.totalorder %s539_s14, 7  ;;  %p74_p2 = scmp.eq.s32.totalorder %s73_s6, 0 }
  0x31   : > { %p1220_p3 = por %p177_p13, %p176_p12  ;;  %p1648_p7 = scmp.lt.s32.totalorder %s1060_s12, 8 }
  0x32   : > { %s1225_s7 = scalar_select %p164_p11, %s1008_s24, %s166_s4  }
  0x33   : > { %s1669_s15 = scalar_select %p1220_p3, 1, 0 }
  0x34   : > { %1671 = sst [smem:[#allocation35_spill]] %s1225_s7  ;;  %p1230_p4 = por %p183_p1, %p182_p0 }
  0x35   : > { %1670 = sst [smem:[#allocation34_spill]] %s1669_s15  ;;  %s222_s0 = sand.u32 1, %s1060_s12  }
  0x36   : > { %s1228_s20 = scalar_select %p74_p2, %s1044_s8, %s76_s22  }
  0x37   : > { %s1673_s5 = scalar_select %p1230_p4, 1, 0 }
  0x38   : > { %1672 = sst [smem:[#allocation36_spill]] %s1228_s20  ;;  %s224_s14 = sand.u32 1, %s1044_s8  }
  0x39   : > { %1674 = sst [smem:[#allocation37_spill]] %s1673_s5  ;;  %p1241_p8 = pnand %p1648_p7, %p1205_p9 }
  0x3a   : > { %s573_s4 = scalar_select %p1205_p9, [#allocation3], [#allocation14] }
  0x3b   : > { %s1740_s18 = smov (!%p1205_p9, %s68_s18), 0  ;;  %s225_s21 = scalar_lea.vmem [#allocation7], %s224_s14 }
  0x3c   : > { %s1742_s4 = smov (!%p1648_p7, %s573_s4), [#allocation18]  ;;  %s1744_s18 = smov (!%p1648_p7, %s1740_s18), 0 }
  0x3d   : > { %s235_s22 = sshll.u32 %s225_s21, 4  ;;  %s228_s6 = sld [smem:[%s1742_s4 + %s1744_s18]]  ;;  %s1253_s22 = int_to_ptr.vmem [resolvable:$true] %s235_s22 }
  0x3e   : > { %p558_p11 = scmp.ge.s32.totalorder %s1060_s12, 1  ;;  %p280_p12 = scmp.lt.s32.totalorder %s1060_s12, 9 }
  0x3f   : > { %s1262_s8 = sld [smem:[#allocation3 + %s1187_s16]]  ;;  %s1272_s18 = scalar_lea.sflag [#allocation8], %s222_s0 }
  0x40   : > { %p1257_p13 = pnand %p558_p11, %p280_p12  ;;  %s1265_s7 = sld [smem:[#allocation3 + %s1190_s17]] }
  0x41   : > { %s1677_s2 = sld [smem:[#allocation40_spill]]  ;;  %p766_p0 = pneg %p1241_p8 }
  0x43   : > { %s553_s25 = sshll.u32 %s228_s6, 4 }
  0x47   : > { %s1270_s15 = scalar_lea.hbm %s1677_s2, %s553_s25  ;;  %s769_s24 = scalar_lea.hbm %s1677_s2, 4096 }
  0x48   : > { %s764_s14 = scalar_lea.hbm %s1270_s15, 16  ;;  %p770_p11 = scmp.lt.u32.totalorder %s1270_s15, %s1677_s2 }
  0x49   : > { %p765_p9 = scmp.ne.s32.totalorder %s1270_s15, %s764_s14  ;;  %p771_p12 = scmp.lt.u32.totalorder %s769_s24, %s764_s14 }
  0x4a   : > { %p773_p6 = scmp.lt.u32.totalorder %s764_s14, %s1270_s15 }
  0x4b   : > { %p767_p1 = pnand %p766_p0, %p765_p9  ;;  %p772_p7 = por %p771_p12, %p770_p11 }
  0x4d   : > { %p768_p2 = pneg %p767_p1  ;;  %p774_p5 = por %p773_p6, %p772_p7 }
  0x4f   : > { %p775_p4 = pnand %p774_p5, %p768_p2 }
  0x51   : > { %778 = shalt.err (!%p775_p4)
}
  0x52   : > { %s779_s0 = scalar_lea.vmem %s1253_s22, 16  ;;  %s1063_s25 = smov [#allocation7]  }
  0x53   : > { %p780_p9 = scmp.ne.s32.totalorder %s1253_s22, %s779_s0  ;;  %s784_s4 = sshll.u32 %s1063_s25, 4  ;;  %s785_s4 = int_to_ptr.vmem [resolvable:$false] %s784_s4 }
  0x54   : > { %s786_s21 = scalar_lea.vmem %s785_s4, 32  ;;  %p787_p10 = scmp.lt.s32.totalorder %s1253_s22, %s785_s4 }
  0x55   : > { %p782_p1 = pnand %p780_p9, %p766_p0  ;;  %p788_p11 = scmp.lt.s32.totalorder %s786_s21, %s779_s0 }
  0x57   : > { %p783_p3 = pneg %p782_p1  ;;  %p789_p12 = por %p788_p11, %p787_p10 }
  0x59   : > { %p790_p6 = pnand %p789_p12, %p783_p3 }
  0x5b   : > { %793 = shalt.err (!%p790_p6)
}
  0x5c   : > { %598 = dma.hbm_to_vmem [thread:$0]  (!%p1241_p8), %s1270_s15, 16, %s1253_s22, %s1272_s18  }
  0x5d   : > { %p51_p5 = scmp.ne.s32.totalorder %s1056_s11, %s1052_s10  ;;  %p57_p10 = scmp.ne.s32.totalorder %s1052_s10, %s1048_s9 }
  0x5e   : > { %s44_s19 = sadd.s32 1, %s1056_s11  ;;  %s203_s14 = sand.u32 1, %s1056_s11  }
  0x5f   : > { %p1678_p3 = scmp.eq.s32.totalorder %s1060_s12, 0  ;;  %p1679_p7 = scmp.eq.s32.totalorder %s1180_s13, 0 }
  0x60   : > { %s41_s5 = ssub.s32 %s1262_s8, %s1265_s7  ;;  %p1682_p8 = scmp.lt.s32.totalorder %s1060_s12, 8 }
  0x61   : > { %p53_p4 = por %p1678_p3, %p51_p5  ;;  %p1310_p0 = por %p1679_p7, %p57_p10 }
  0x62   : > { %p42_p2 = scmp.eq.s32.totalorder %s41_s5, 0  ;;  %p1683_p9 = pmov %p1682_p8 }
  0x63   : > { %s1680_s24 = scalar_select %p1310_p0, 1, 0 }
  0x64   : > { %s570_s6 = scalar_select %p53_p4, [#allocation3], [#allocation13] }
  0x65   : > { %s1317_s15 = scalar_select %p42_p2, %s1056_s11, %s44_s19  }
  0x66   : > { %s571_s9 = scalar_select %p53_p4, %s1187_s16, 0 }
  0x67   : > { %1681 = sst [smem:[#allocation38_spill]] %s1317_s15  ;;  %s1746_s6 = smov (!%p1682_p8, %s570_s6), [#allocation17] }
  0x68   : > { %s1748_s9 = smov (!%p1683_p9, %s571_s9), 0  ;;  %s206_s22 = scalar_lea.vmem [#allocation4], %s203_s14 }
  0x69   : > { %s215_s0 = sshll.u32 %s206_s22, 4  ;;  %p1684_p1 = pmov %p1682_p8  ;;  %s1330_s0 = int_to_ptr.vmem [resolvable:$true] %s215_s0 }
  0x6a   : > { %s208_s7 = sld [smem:[%s1746_s6 + %s1748_s9]]  ;;  %s100_s8 = sadd.s32 2, %s1187_s16 }
  0x6b   : > { %p1326_p11 = pnand %p1684_p1, %p53_p4  ;;  %s103_s4 = sadd.s32 2, %s1190_s17 }
  0x6c   : > { %s1336_s21 = sld [smem:[#allocation3 + %s100_s8]]  ;;  %s204_s6 = scalar_lea.sflag [#allocation5], %s203_s14 }
  0x6d   : > { %s1338_s19 = sld [smem:[#allocation3 + %s103_s4]]  ;;  %p796_p5 = pneg %p1326_p11 }
  0x6e   : > { %s1686_s1 = sld [smem:[#allocation39_spill]] }
  0x70   : > { %s551_s5 = sshll.u32 %s208_s7, 4 }
  0x74   : > { %s1343_s15 = scalar_lea.hbm %s1686_s1, %s551_s5  ;;  %s799_s2 = scalar_lea.hbm %s1686_s1, 4096 }
  0x75   : > { %s794_s9 = scalar_lea.hbm %s1343_s15, 16  ;;  %p800_p4 = scmp.lt.u32.totalorder %s1343_s15, %s1686_s1 }
  0x76   : > { %p795_p6 = scmp.ne.s32.totalorder %s1343_s15, %s794_s9  ;;  %p801_p7 = scmp.lt.u32.totalorder %s799_s2, %s794_s9 }
  0x77   : > { %p803_p8 = scmp.lt.u32.totalorder %s794_s9, %s1343_s15 }
  0x78   : > { %p797_p10 = pnand %p796_p5, %p795_p6  ;;  %p802_p2 = por %p801_p7, %p800_p4 }
  0x7a   : > { %p798_p3 = pneg %p797_p10  ;;  %p804_p9 = por %p803_p8, %p802_p2 }
  0x7c   : > { %p805_p1 = pnand %p804_p9, %p798_p3 }
  0x7e   : > { %808 = shalt.err (!%p805_p1)
}
  0x7f   : > { %s809_s14 = scalar_lea.vmem %s1330_s0, 16  ;;  %s1064_s7 = smov [#allocation4]  }
  0x80   : > { %p810_p6 = scmp.ne.s32.totalorder %s1330_s0, %s809_s14  ;;  %s814_s4 = sshll.u32 %s1064_s7, 4  ;;  %s815_s4 = int_to_ptr.vmem [resolvable:$false] %s814_s4 }
  0x81   : > { %s816_s5 = scalar_lea.vmem %s815_s4, 32  ;;  %p817_p0 = scmp.lt.s32.totalorder %s1330_s0, %s815_s4 }
  0x82   : > { %p812_p10 = pnand %p810_p6, %p796_p5  ;;  %p818_p4 = scmp.lt.s32.totalorder %s816_s5, %s809_s14 }
  0x84   : > { %p813_p12 = pneg %p812_p10  ;;  %p819_p7 = por %p818_p4, %p817_p0 }
  0x86   : > { %p820_p2 = pnand %p819_p7, %p813_p12 }
  0x88   : > { %823 = shalt.err (!%p820_p2)
}
  0x89   : > { %593 = dma.hbm_to_vmem [thread:$0]  (!%p1326_p11), %s1343_s15, 16, %s1330_s0, %s204_s6  }
  0x8a   : > { %p1687_p0 = scmp.eq.s32.totalorder %s1060_s12, 0  ;;  %p1688_p12 = scmp.ne.s32.totalorder %s1032_s30, %s1028_s29 }
  0x8b   : > { %p121_p3 = scmp.ne.s32.totalorder %s1028_s29, %s1024_s28  ;;  %s108_s9 = sadd.s32 1, %s1032_s30 }
  0x8c   : > { %p1377_p5 = por %p1688_p12, %p1687_p0  ;;  %s244_s2 = sand.u32 1, %s1032_s30  }
  0x8d   : > { %s105_s22 = ssub.s32 %s1336_s21, %s1338_s19  ;;  %p1690_p8 = scmp.eq.s32.totalorder %s1180_s13, 0 }
  0x8e   : > { %p106_p11 = scmp.eq.s32.totalorder %s105_s22, 0  ;;  %s1750_s8 = smov (!%p1377_p5, %s100_s8), 0 }
  0x8f   : > { %p1389_p9 = por %p121_p3, %p1690_p8  ;;  %p1692_p1 = scmp.lt.s32.totalorder %s1060_s12, 8 }
  0x90   : > { %s576_s15 = scalar_select %p1377_p5, [#allocation3], [#allocation15] }
  0x91   : > { %s1691_s14 = scalar_select %p1389_p9, 1, 0 }
  0x92   : > { %s1396_s0 = scalar_select %p106_p11, %s1032_s30, %s108_s9  }
  0x93   : > { %s1752_s15 = smov (!%p1692_p1, %s576_s15), [#allocation19]  ;;  %p1693_p6 = pmov %p1692_p1 }
  0x94   : > { %s245_s28 = scalar_lea.vmem [#allocation9], %s244_s2  ;;  %p1694_p10 = pmov %p1692_p1 }
  0x95   : > { %s1754_s8 = smov (!%p1693_p6, %s1750_s8), 0  ;;  %s255_s21 = sshll.u32 %s245_s28, 4  ;;  %s1414_s21 = int_to_ptr.vmem [resolvable:$true] %s255_s21 }
  0x96   : > { %p1410_p4 = pnand %p1694_p10, %p1377_p5  ;;  %s248_s6 = sld [smem:[%s1752_s15 + %s1754_s8]] }
  0x97   : > { %s132_s7 = sadd.s32 3, %s1187_s16  ;;  %s135_s4 = sadd.s32 3, %s1190_s17 }
  0x98   : > { %s1420_s5 = sld [smem:[#allocation3 + %s132_s7]]  ;;  %p826_p0 = pneg %p1410_p4 }
  0x99   : > { %s1422_s9 = sld [smem:[#allocation3 + %s135_s4]] }
  0x9c   : > { %s555_s2 = sshll.u32 %s248_s6, 4  ;;  %s829_s6 = scalar_lea.hbm %s1632_s3, 4096 }
  0x9d   : > { %s1427_s28 = scalar_lea.hbm %s1632_s3, %s555_s2 }
  0x9e   : > { %s824_s8 = scalar_lea.hbm %s1427_s28, 16  ;;  %p830_p3 = scmp.lt.u32.totalorder %s1427_s28, %s1632_s3 }
  0x9f   : > { %p825_p2 = scmp.ne.s32.totalorder %s1427_s28, %s824_s8  ;;  %p831_p8 = scmp.lt.u32.totalorder %s829_s6, %s824_s8 }
  0xa0   : > { %p833_p1 = scmp.lt.u32.totalorder %s824_s8, %s1427_s28 }
  0xa1   : > { %p827_p12 = pnand %p826_p0, %p825_p2  ;;  %p832_p11 = por %p831_p8, %p830_p3 }
  0xa3   : > { %p828_p5 = pneg %p827_p12  ;;  %p834_p6 = por %p833_p1, %p832_p11 }
  0xa5   : > { %p835_p10 = pnand %p834_p6, %p828_p5 }
  0xa7   : > { %838 = shalt.err (!%p835_p10)
}
  0xa8   : > { %s839_s22 = scalar_lea.vmem %s1414_s21, 16  ;;  %s1065_s25 = smov [#allocation9]  }
  0xa9   : > { %p840_p2 = scmp.ne.s32.totalorder %s1414_s21, %s839_s22  ;;  %s844_s17 = sshll.u32 %s1065_s25, 4  ;;  %s845_s17 = int_to_ptr.vmem [resolvable:$false] %s844_s17 }
  0xaa   : > { %s846_s15 = scalar_lea.vmem %s845_s17, 32  ;;  %p847_p9 = scmp.lt.s32.totalorder %s1414_s21, %s845_s17 }
  0xab   : > { %p842_p12 = pnand %p840_p2, %p826_p0  ;;  %p848_p3 = scmp.lt.s32.totalorder %s846_s15, %s839_s22 }
  0xad   : > { %p843_p7 = pneg %p842_p12  ;;  %p849_p8 = por %p848_p3, %p847_p9 }
  0xaf   : > { %p850_p11 = pnand %p849_p8, %p843_p7 }
  0xb1   : > { %853 = shalt.err (!%p850_p11)
}
  0xb2   : > { %s1696_s8 = sld [smem:[#allocation29_spill]]  ;;  %s140_s19 = sadd.s32 1, %s1020_s27 }
  0xb3   : > { %603 = dma.hbm_to_vmem [thread:$0]  (!%p1410_p4), %s1427_s28, 16, %s1414_s21, %s1272_s18  }
  0xb4   : > { %p1697_p7 = scmp.eq.s32.totalorder %s1060_s12, 0  ;;  %p1698_p0 = scmp.ne.s32.totalorder %s1020_s27, %s1016_s26 }
  0xb5   : > { %s137_s6 = ssub.s32 %s1420_s5, %s1422_s9  ;;  %p1699_p1 = scmp.eq.s32.totalorder %s1180_s13, 0 }
  0xb6   : > { %p149_p5 = por %p1698_p0, %p1697_p7  ;;  %p138_p10 = scmp.eq.s32.totalorder %s137_s6, 0 }
  0xb7   : > { %s262_s2 = sand.u32 1, %s1020_s27   ;;  %p1701_p2 = scmp.lt.s32.totalorder %s1060_s12, 8 }
  0xb8   : > { %p153_p9 = scmp.ne.s32.totalorder %s1016_s26, %s1696_s8  ;;  %s1756_s7 = smov (!%p149_p5, %s132_s7), 0 }
  0xb9   : > { %p1476_p12 = pnand %p1701_p2, %p149_p5  ;;  %p1703_p4 = pmov %p1701_p2 }
  0xba   : > { %p1469_p6 = por %p153_p9, %p1699_p1  ;;  %p1704_p3 = pmov %p1701_p2 }
  0xbb   : > { %s1481_s18 = scalar_select %p138_p10, %s1020_s27, %s140_s19  }
  0xbc   : > { %s1700_s4 = scalar_select %p1469_p6, 1, 0 }
  0xbd   : > { %s579_s21 = scalar_select %p149_p5, [#allocation3], [#allocation16] }
  0xbe   : > { %s1760_s7 = smov (!%p1704_p3, %s1756_s7), 0  ;;  %s265_s9 = scalar_lea.vmem [#allocation10], %s262_s2 }
  0xbf   : > { %s1758_s21 = smov (!%p1703_p4, %s579_s21), [#allocation20]  ;;  %s275_s28 = sshll.u32 %s265_s9, 4  ;;  %s1489_s28 = int_to_ptr.vmem [resolvable:$true] %s275_s28 }
  0xc0   : > { %s268_s5 = sld [smem:[%s1758_s21 + %s1760_s7]]  ;;  %s263_s16 = scalar_lea.sflag [#allocation11], %s262_s2 }
  0xc1   : > { %s1705_s8 = sld [smem:[#allocation41_spill]]  ;;  %p856_p11 = pneg %p1476_p12 }
  0xc6   : > { %s557_s25 = sshll.u32 %s268_s5, 4 }
  0xc7   : > { %s1706_s1 = smov %s1705_s8  ;;  %s1494_s6 = scalar_lea.hbm %s1705_s8, %s557_s25 }
  0xc8   : > { %s854_s19 = scalar_lea.hbm %s1494_s6, 16  ;;  %s859_s5 = scalar_lea.hbm %s1706_s1, 4096 }
  0xc9   : > { %p855_p8 = scmp.ne.s32.totalorder %s1494_s6, %s854_s19  ;;  %p860_p0 = scmp.lt.u32.totalorder %s1494_s6, %s1706_s1 }
  0xca   : > { %p861_p5 = scmp.lt.u32.totalorder %s859_s5, %s854_s19  ;;  %p863_p10 = scmp.lt.u32.totalorder %s854_s19, %s1494_s6 }
  0xcb   : > { %p857_p9 = pnand %p856_p11, %p855_p8 }
  0xcc   : > { %p862_p1 = por %p861_p5, %p860_p0 }
  0xcd   : > { %p858_p7 = pneg %p857_p9 }
  0xce   : > { %p864_p2 = por %p863_p10, %p862_p1 }
  0xd0   : > { %p865_p4 = pnand %p864_p2, %p858_p7 }
  0xd2   : > { %868 = shalt.err (!%p865_p4)
}
  0xd3   : > { %s869_s2 = scalar_lea.vmem %s1489_s28, 16  ;;  %s1066_s17 = smov [#allocation10]  }
  0xd4   : > { %p870_p3 = scmp.ne.s32.totalorder %s1489_s28, %s869_s2  ;;  %s874_s15 = sshll.u32 %s1066_s17, 4  ;;  %s875_s15 = int_to_ptr.vmem [resolvable:$false] %s874_s15 }
  0xd5   : > { %s876_s8 = scalar_lea.vmem %s875_s15, 32  ;;  %p877_p6 = scmp.lt.s32.totalorder %s1489_s28, %s875_s15 }
  0xd6   : > { %p872_p8 = pnand %p870_p3, %p856_p11  ;;  %p878_p0 = scmp.lt.s32.totalorder %s876_s8, %s869_s2 }
  0xd8   : > { %p873_p9 = pneg %p872_p8  ;;  %p879_p5 = por %p878_p0, %p877_p6 }
  0xda   : > { %p880_p1 = pnand %p879_p5, %p873_p9 }
  0xdc   : > { %883 = shalt.err (!%p880_p1)
}
  0xdd   : > { %608 = dma.hbm_to_vmem [thread:$0]  (!%p1476_p12), %s1494_s6, 16, %s1489_s28, %s263_s16  }
  0xde   : > { %284 = sbr.rel (%p1257_p13) target bundleno = 435 (0x1b3), region = 36  ;;  %s286_s19 = sand.u32 (!%p1257_p13), 1, %s1052_s10  }
  0xdf   : > { %s287_s7 = scalar_lea.sflag (!%p1257_p13), [#allocation5], %s286_s19  ;;  %s289_s21 = scalar_lea.vmem (!%p1257_p13), [#allocation4], %s286_s19 }
  0xe0   : > { %p1707_p11 = scmp.ne.s32.totalorder (!%p1257_p13), %s1680_s24, 0 }
  0xe5   : > { %979 = dma.done.wait (%p1707_p11), %s287_s7, 16  }
  0xe6   : > { %981 = vsyncadd (%p1707_p11), %s287_s7, 4294967280  ;;  %s1708_s5 = sld [smem:[#allocation30_spill]]  ;;  %s294_s22 = sand.u32 1, %s1180_s13  }
  0xe7   : > { %s1709_s9 = sld [smem:[#allocation33_spill]]  ;;  %s295_s2 = scalar_lea.sflag [#allocation8], %s294_s22 }
  0xec   : > { %s296_s25 = sand.u32 1, %s1708_s5  }
  0xed   : > { %s297_s28 = scalar_lea.vmem [#allocation7], %s296_s25  ;;  %p1710_p6 = scmp.ne.s32.totalorder %s1709_s9, 0 }
  0xef   : > { %983 = dma.done.wait (%p1710_p6), %s295_s2, 16  }
  0xf0   : > { %985 = vsyncadd (%p1710_p6), %s295_s2, 4294967280  ;;  %s304_s20 = sand.u32 1, %s1028_s29   ;;  %p1711_p13 = scmp.ne.s32.totalorder %s1691_s14, 0 }
  0xf1   : > { %s305_s6 = scalar_lea.vmem [#allocation9], %s304_s20 }
  0xf2   : > { %987 = dma.done.wait (%p1711_p13), %s295_s2, 16  }
  0xf3   : > { %989 = vsyncadd (%p1711_p13), %s295_s2, 4294967280  ;;  %s310_s24 = sand.u32 1, %s1016_s26   ;;  %p1712_p12 = scmp.ne.s32.totalorder %s1700_s4, 0 }
  0xf4   : > { %s311_s16 = scalar_lea.sflag [#allocation11], %s310_s24  ;;  %s313_s17 = scalar_lea.vmem [#allocation10], %s310_s24 }
  0xf5   : > { %991 = dma.done.wait (%p1712_p12), %s311_s16, 16  }
  0xf6   : > { %993 = vsyncadd (%p1712_p12), %s311_s16, 4294967280  ;;  %vm361_vm0 = vcmask 1040384   ;;  %v382_v0 = vld [vmem:[%s305_s6] sm:$0x1]  ;;  %s346_s14 = sand.u32 1, %s1004_s23   ;;  %s1713_s4 = sld [smem:[#allocation34_spill]] }
  0xf7   : > { %v359_v1 = vld [vmem:[%s289_s21] sm:$0x1]  ;;  %v383_v3 = vmul.f32 %v382_v0, %v382_v0  ;;  %s559_s15 = sshll.u32 %s1180_s13, 4  ;;  %s347_s8 = scalar_lea.vmem [#allocation12], %s346_s14 }
  0xf8   : > { %v393_v2 = vld [vmem:[%s313_s17] sm:$0x1]  ;;  %v360_v4 = vmul.f32 %v359_v1, %v359_v1  ;;  %s419_s19 = sshll.u32 %s347_s8, 4  ;;  %s1714_s5 = sld [smem:[#allocation42_spill]]  ;;  %s1551_s19 = int_to_ptr.vmem [resolvable:$true] %s419_s19 }
  0xf9   : > { %v394_v5 = vmul.f32 %v393_v2, %v393_v2  ;;  %v371_v6 = vld [vmem:[%s297_s28] sm:$0x1]  ;;  %v384_v8 = vsel %vm361_vm0, %v383_v3, 0.0  ;;  %s407_s22 = scalar_lea.sflag [#allocation6], %s346_s14  ;;  %s884_s25 = scalar_lea.vmem %s1551_s19, 16 }
  0xfa   : > { %v372_v7 = vmul.f32 %v371_v6, %v371_v6  ;;  %v362_v9 = vsel %vm361_vm0, %v360_v4, 0.0  ;;  %385 = vadd.xlane.f32.xlu1 %v384_v8  ;;  %p885_p7 = scmp.ne.s32.totalorder %s1551_s19, %s884_s25  ;;  %s1067_s13 = smov [#allocation12]  }
  0xfb   : > { %363 = vadd.xlane.f32.xlu0 %v362_v9  ;;  %v395_v10 = vsel %vm361_vm0, %v394_v5, 0.0  ;;  %s888_s2 = sshll.u32 %s1067_s13, 4  ;;  %s889_s2 = int_to_ptr.vmem [resolvable:$false] %s888_s2 }
  0xfc   : > { %v373_v11 = vsel %vm361_vm0, %v372_v7, 0.0  ;;  %p1715_p10 = scmp.ne.s32.totalorder %s1713_s4, 0  ;;  %s890_s28 = scalar_lea.vmem %s889_s2, 32 }
  0xfd   : > { %p891_p3 = scmp.lt.s32.totalorder %s1551_s19, %s889_s2  ;;  %p892_p8 = scmp.lt.s32.totalorder %s890_s28, %s884_s25 }
  0xfe   : > { %396 = vadd.xlane.f32.xlu1 %v395_v10  ;;  %s1549_s9 = scalar_lea.hbm %s1714_s5, %s559_s15  ;;  %p886_p2 = pnand %p885_p7, %p1715_p10 }
  0xff   : > { %374 = vadd.xlane.f32.xlu0 %v373_v11  ;;  %p893_p9 = por %p892_p8, %p891_p3 }
 0x100   : > { %p887_p4 = pneg %p886_p2 }
 0x102   : > { %p894_p0 = pnand %p893_p9, %p887_p4 }
 0x187   : > { %v386_v12 = vpop.xlane.xlu1 %385 }
 0x188   : > { %v364_v13 = vpop.xlane.xlu0 %363  ;;  %v388_v15 = vadd.f32 1e-14, %v386_v12  ;;  %vm387_vm2 = vcmp.gt.f32.partialorder %v386_v12, 1.0 }
 0x189   : > { %v366_v14 = vadd.f32 1e-14, %v364_v13  ;;  %vm365_vm1 = vcmp.gt.f32.partialorder %v364_v13, 1.0 }
 0x18b   : > { %744 = vrsqrt.f32 %v366_v14  ;;  %v397_v16 = vpop.xlane.xlu1 %396 }
 0x18c   : > { %v375_v17 = vpop.xlane.xlu0 %374  ;;  %v399_v18 = vadd.f32 1e-14, %v397_v16  ;;  %746 = vrsqrt.f32 %v388_v15  ;;  %vm398_vm4 = vcmp.gt.f32.partialorder %v397_v16, 1.0 }
 0x18d   : > { %v377_v19 = vadd.f32 1e-14, %v375_v17  ;;  %vm376_vm3 = vcmp.gt.f32.partialorder %v375_v17, 1.0 }
 0x18e   : > { %748 = vrsqrt.f32 %v399_v18 }
 0x18f   : > { %750 = vrsqrt.f32 %v377_v19 }
 0x195   : > { %v745_v20 = vpop.eup %744 }
 0x196   : > { %v747_v21 = vpop.eup %746  ;;  %v368_v23 = vsel %vm365_vm1, %v745_v20, 1.0 }
 0x197   : > { %v390_v25 = vsel %vm387_vm2, %v747_v21, 1.0  ;;  %v369_v27 = vmul.f32 %v368_v23, %v359_v1 }
 0x198   : > { %v749_v22 = vpop.eup %748  ;;  %v391_v30 = vmul.f32 %v390_v25, %v382_v0 }
 0x199   : > { %v751_v24 = vpop.eup %750  ;;  %v401_v29 = vsel %vm398_vm4, %v749_v22, 1.0 }
 0x19a   : > { %v379_v26 = vsel %vm376_vm3, %v751_v24, 1.0  ;;  %v402_v32 = vmul.f32 %v401_v29, %v393_v2 }
 0x19b   : > { %v380_v28 = vmul.f32 %v379_v26, %v371_v6 }
 0x19d   : > { %v381_v31 = vadd.f32 %v380_v28, %v369_v27 }
 0x19f   : > { %v392_v33 = vadd.f32 %v391_v30, %v381_v31 }
 0x1a1   : > { %v403_v34 = vadd.f32 %v402_v32, %v392_v33 }
 0x1a3   : > { %v404_v35 = vmul.f32 0.25, %v403_v34 }
 0x1a5   : > { %405 = vst [vmem:[%s347_s8] sm:$0x1] %v404_v35 }
 0x1a6   : > { %897 = shalt.err (!%p894_p0)
}
 0x1a7   : > { %s898_s20 = scalar_lea.hbm %s1549_s9, 16  ;;  %s902_s16 = scalar_lea.hbm %s1714_s5, 128 }
 0x1a8   : > { %p899_p5 = scmp.ne.s32.totalorder %s1549_s9, %s898_s20  ;;  %p903_p6 = scmp.lt.u32.totalorder %s1549_s9, %s1714_s5 }
 0x1a9   : > { %p904_p13 = scmp.lt.u32.totalorder %s902_s16, %s898_s20  ;;  %p906_p7 = scmp.lt.u32.totalorder %s898_s20, %s1549_s9 }
 0x1aa   : > { %p900_p1 = pnand %p899_p5, %p1715_p10 }
 0x1ab   : > { %p905_p12 = por %p904_p13, %p903_p6 }
 0x1ac   : > { %p901_p11 = pneg %p900_p1 }
 0x1ad   : > { %p907_p2 = por %p906_p7, %p905_p12 }
 0x1af   : > { %p908_p4 = pnand %p907_p2, %p901_p11 }
 0x1b1   : > { %911 = shalt.err (!%p908_p4)
}
 0x1b2   : > { %586 = dma.vmem_to_hbm [thread:$0]  (%p1715_p10), %s1551_s19, 16, %s1549_s9, %s407_s22  }
 0x1b3 PF: > { %s1716_s15 = sld [smem:[#allocation27_spill]]  ;;  %s1717_s8 = sld [smem:[#allocation37_spill]] }
 0x1b4   : > { %p614_p3 = scmp.ge.s32.totalorder %s1060_s12, 2 }
 0x1b9   : > { %s431_s7 = sand.u32 1, %s1716_s15   ;;  %p1718_p8 = scmp.ne.s32.totalorder %s1717_s8, 0 }
 0x1ba   : > { %s432_s21 = scalar_lea.sflag [#allocation6], %s431_s7 }
 0x1bb   : > { %p610_p9 = pnand %p614_p3, %p1718_p8 }
 0x1bd   : > { %995 = dma.done.wait (!%p610_p9), %s432_s21, 16  }
 0x1be   : > { %997 = vsyncadd (!%p610_p9), %s432_s21, 4294967280  ;;  %s1719_s12 = sld [smem:[#allocation32_spill]]  ;;  %s1720_s25 = sld [smem:[#allocation28_spill]] }
 0x1bf   : > { %s1721_s24 = sld [smem:[#allocation35_spill]]  ;;  %s1722_s4 = smov %s1396_s0 }
 0x1c0   : > { %s1723_s6 = sld [smem:[#allocation30_spill]]  ;;  %s1724_s7 = sld [smem:[#allocation31_spill]] }
 0x1c1   : > { %s1725_s8 = sld [smem:[#allocation36_spill]]  ;;  %s1726_s19 = sld [smem:[#allocation38_spill]] }
 0x1c2   : > { %s1727_s0 = smov %s1004_s23  ;;  %s1733_s28 = smov %s1028_s29 }
 0x1c3   : > { %s1734_s29 = smov %s1032_s30  ;;  %s1735_s30 = smov %s1722_s4 }
 0x1c4   : > { %p30_p10 = scmp.ge.s32.totalorder %s1719_s12, 10   ;;  %s1729_s23 = smov %s1720_s25 }
 0x1c5   : > { %s1730_s25 = smov %s1016_s26  ;;  %s1731_s26 = smov %s1020_s27 }
 0x1c6   : > { %s1732_s27 = smov %s1481_s18  ;;  %s1736_s9 = smov %s1052_s10 }
 0x1c7   : > { %s1737_s10 = smov %s1056_s11  ;;  %s1738_s11 = smov %s1726_s19 }
 0x1c8   :  { %32 = sbr.rel (!%p30_p10) target bundleno = 32 (0x20), region = 118 }
 0x1cf   :  { %436 = vsyncpa [#allocation5], 1 }
 0x1d0   :  { %438 = vsyncpa [#allocation5 + $0x1], 1 }
 0x1d1   :  { %439 = vsyncpa [#allocation8], 1 }
 0x1d2   :  { %441 = vsyncpa [#allocation8 + $0x1], 1 }
 0x1d3   :  { %442 = vsyncpa [#allocation11], 1 }
 0x1d4   :  { %444 = vsyncpa [#allocation11 + $0x1], 1 }
 0x1d5   :  { %445 = vsyncpa [#allocation6], 1 }
 0x1d6   :  { %447 = vsyncpa [#allocation6 + $0x1], 1 }

</bundles_post_ra>
